<compile_context>
chip_gen: v5e
topology: v5e:2x2
jax: 0.10.0
libtpu: 0.0.40
codegen_flags: <defaults>
</compile_context>

<pallas_src>
import jax
import jax.numpy as jnp
from jax.experimental import pallas as pl
from jax.experimental.pallas import tpu as pltpu

_LANES = 128
_TILE_ROWS = 4096                       # 2 MiB per f32 block, 1 MiB bf16
_TARGET_BLOCK_BYTES = 2 * 1024 * 1024   # per-buffer target for the ragged path
_MAX_BLOCK_BYTES = 8 * 1024 * 1024      # hard cap: 4 live buffers stay < 32 MiB
_VMEM_LIMIT_BYTES = 32 * 1024 * 1024    # explicit scoped-VMEM request (all gens)
_SMALL_FALLBACK_BYTES = 256 * 1024      # below this, pallas_call is launch-bound


def _exp_kernel(x_ref, o_ref):
    o_ref[...] = jnp.exp(x_ref[...])


def _sublane_multiple(dtype) -> int:
    # Sub-32-bit dtypes pack along sublanes: 8 rows for 32-bit, 16 for 16-bit,
    # 32 for 8-bit dtypes.
    itemsize = jnp.dtype(dtype).itemsize
    return max(8, 32 // max(itemsize, 1))


def _compiler_params():
    return pltpu.CompilerParams(
        dimension_semantics=("parallel",),        # shard grid across v7x's 2 TCs
        vmem_limit_bytes=_VMEM_LIMIT_BYTES,
    )


def _run_exp_2d(x2d: jax.Array, tile_rows: int) -> jax.Array:
    """Run the exp kernel over a 2-D array, tiling rows; cdiv grid masks edges."""
    rows, cols = x2d.shape
    itemsize = jnp.dtype(x2d.dtype).itemsize
    grid = (pl.cdiv(rows, tile_rows),)
    return pl.pallas_call(
        _exp_kernel,
        out_shape=jax.ShapeDtypeStruct((rows, cols), x2d.dtype),
        grid_spec=pltpu.PrefetchScalarGridSpec(
            num_scalar_prefetch=0,
            grid=grid,
            in_specs=[pl.BlockSpec((tile_rows, cols), lambda i: (i, 0))],
            out_specs=pl.BlockSpec((tile_rows, cols), lambda i: (i, 0)),
        ),
        compiler_params=_compiler_params(),
        cost_estimate=pl.CostEstimate(
            flops=0,
            transcendentals=rows * cols,
            bytes_accessed=2 * rows * cols * itemsize,
        ),
    )(x2d)


def exponential(x: jax.Array, *, small_fallback_bytes: int = _SMALL_FALLBACK_BYTES) -> jax.Array:
    """Elementwise exp via a Pallas TPU kernel. Matches torch.exp(x)."""
    orig_shape = x.shape
    dtype = x.dtype
    n = x.size
    itemsize = jnp.dtype(dtype).itemsize

    # Tiny / degenerate inputs: a fused XLA exp beats pallas_call launch cost.
    if n == 0 or x.ndim == 0 or n * itemsize < small_fallback_bytes:
        return jnp.exp(x)

    sublane = _sublane_multiple(dtype)

    if n % _LANES == 0:
        # Fast path: free (bitcast) reshape to a lane-dense (rows, 128) slab;
        # no pad, no trailing slice.  tile_rows is either the full row count
        # (block == full dims, no divisibility requirement) or _TILE_ROWS
        # (a multiple of every dtype's sublane packing); the cdiv grid masks a
        # ragged last row-block.
        rows = n // _LANES
        x2d = x.reshape(rows, _LANES)
        tile_rows = min(_TILE_ROWS, rows)
        return _run_exp_2d(x2d, tile_rows).reshape(orig_shape)

    # Ragged path (n not a multiple of 128): operate directly on a
    # (prod(leading dims), last_dim) view — a metadata-only reshape — and let
    # the cdiv grid mask the ragged row / lane edges.  This replaces the old
    # pad-whole-array + trailing-slice round trip (~3x HBM traffic) with zero
    # extra copies.
    cols = orig_shape[-1]
    rows = n // cols
    row_bytes = cols * itemsize
    tile_rows = max(sublane, (_TARGET_BLOCK_BYTES // max(row_bytes, 1)) // sublane * sublane)
    if tile_rows >= rows:
        tile_rows = rows  # block == full dims; no divisibility requirement
    if tile_rows * row_bytes > _MAX_BLOCK_BYTES:
        # TODO(synk): shapes with one enormous non-128-multiple trailing dim
        # would need an in-kernel masked tail; fall back to XLA's fused exp.
        return jnp.exp(x)
    x2d = x.reshape(rows, cols)
    return _run_exp_2d(x2d, tile_rows).reshape(orig_shape)


if __name__ == "__main__":
    key = jax.random.PRNGKey(0)
    k0, k1, k2 = jax.random.split(key, 3)

    # Primary shape from the module spec: (2, 4, 16, 16) f32.  Force the Pallas
    # path (the default wrapper would take the small-size XLA fallback here).
    x = jax.random.normal(k0, (2, 4, 16, 16), dtype=jnp.float32)
    y = exponential(x, small_fallback_bytes=0)
    jax.block_until_ready(y)
    assert y.shape == x.shape and y.dtype == x.dtype
    assert jnp.allclose(y, jnp.exp(x), rtol=1e-6, atol=1e-6)

    # Default wrapper (small-size fallback) must match as well.
    y_d = exponential(x)
    jax.block_until_ready(y_d)
    assert jnp.allclose(y_d, jnp.exp(x), rtol=1e-6, atol=1e-6)

    # Larger 128-aligned shape: exercises the tiled fast path with grid > 1
    # (5120 rows -> one full 4096-row block + a masked ragged block).
    xa = jax.random.normal(k1, (4, 1024, 160), dtype=jnp.float32)
    ya = exponential(xa)
    jax.block_until_ready(ya)
    assert jnp.allclose(ya, jnp.exp(xa), rtol=1e-6, atol=1e-6)

    # Ragged (non-128-multiple) shapes: pad-free (rows, last_dim) path.
    xb = jax.random.normal(k2, (513, 1031), dtype=jnp.float32)
    yb = exponential(xb)
    jax.block_until_ready(yb)
    assert jnp.allclose(yb, jnp.exp(xb), rtol=1e-6, atol=1e-6)

    xc = jax.random.normal(jax.random.PRNGKey(1), (3, 5, 7), dtype=jnp.float32)
    yc = exponential(xc, small_fallback_bytes=0)
    jax.block_until_ready(yc)
    assert jnp.allclose(yc, jnp.exp(xc), rtol=1e-6, atol=1e-6)

    print("KERNEL_OK")
</pallas_src>

<mosaic_0001>
module attributes {stable_mosaic.version = 11 : i64} {
  func.func @_exp_kernel(%arg0: i32, %arg1: memref<16x128xf32, #tpu.memory_space<vmem>>, %arg2: memref<16x128xf32, #tpu.memory_space<vmem>>) attributes {dimension_semantics = [#tpu.dimension_semantics<parallel>], iteration_bounds = array<i64: 1>, scalar_prefetch = 0 : i64, scratch_operands = 0 : i64, tpu.core_type = #tpu.core_type<tc>, window_params = [{transform_indices = @transform_0, window_bounds = array<i64: 16, 128>}, {transform_indices = @transform_1, window_bounds = array<i64: 16, 128>}]} {
    %c0 = arith.constant 0 : index
    %c0_0 = arith.constant 0 : index
    %0 = vector.load %arg1[%c0, %c0_0] : memref<16x128xf32, #tpu.memory_space<vmem>>, vector<16x128xf32>
    %1 = math.exp %0 : vector<16x128xf32>
    %c0_1 = arith.constant 0 : index
    %c0_2 = arith.constant 0 : index
    %2 = vector.load %arg2[%c0_1, %c0_2] : memref<16x128xf32, #tpu.memory_space<vmem>>, vector<16x128xf32>
    tpu.vector_store %arg2[%c0_1, %c0_2], %1 {strides = array<i32>} : memref<16x128xf32, #tpu.memory_space<vmem>>, vector<16x128xf32>,
    return
  }
  func.func @transform_0(%arg0: i32) -> (i32, i32) {
    %c0_i32 = arith.constant 0 : i32
    %c0_i32_0 = arith.constant 0 : i32
    return %arg0, %c0_i32 : i32, i32
  }
  func.func @transform_1(%arg0: i32) -> (i32, i32) {
    %c0_i32 = arith.constant 0 : i32
    %c0_i32_0 = arith.constant 0 : i32
    return %arg0, %c0_i32 : i32, i32
  }
}

</mosaic_0001>

<bundles_post_ra>
// kernel: tpu_custom_call.1
= control target key start
LH: loop header
LB: loop body
LE: loop exit
PB: predicated region body
PF: predicated region fallthrough
CT: control target
= control target key end

     0   :  { %6 = vsyncpa [#allocation3], 0  ;;  %s132_s0 = inlined_call_operand.hbm [shape: f32[16,128], index: 0, kind: input, shape index: {}]   ;;  %s133_s1 = inlined_call_operand.hbm [shape: f32[16,128], index: 1, kind: output, shape index: {}]  }
   0x1   :  { %7 = vsyncpa [#allocation4], 0  ;;  %s12_s8 = sshll.u32 %s132_s0, 4  ;;  %s112_s9 = smov [#allocation2]   ;;  %s13_s8 = int_to_ptr.hbm [resolvable:$true] %s12_s8 }
   0x2   :  { %s14_s10 = sshll.u32 %s112_s9, 4  ;;  %s113_s11 = smov 128   ;;  %s15_s10 = int_to_ptr.vmem [resolvable:$true] %s14_s10 }
   0x3   :  { %s114_s12 = smov 8  }
   0x4   :  { %20 = dma.hbm_to_vmem [thread:$0]  %s13_s8, 256, %s15_s10, [#allocation3], %s113_s11, %s113_s11, %s114_s12  }
   0x5   :  { %108 = dma.done.wait [#allocation3], 256  }
   0x6   :  { %109 = vsyncadd [#allocation3], 4294967040  ;;  %v25_v0 = vld [vmem:[#allocation2] sm:$0xff]  ;;  %v26_v1 = vld [vmem:[#allocation2 + $0x8] sm:$0xff]  ;;  %s115_s13 = smov [#allocation5]   ;;  %s39_s0 = sshll.u32 %s133_s1, 4  ;;  %s40_s0 = int_to_ptr.hbm [resolvable:$true] %s39_s0 }
   0x7   :  { %v27_v2 = vmul.f32 1.442695, %v25_v0  ;;  %v29_v3 = vmul.f32 1.442695, %v26_v1  ;;  %s37_s14 = sshll.u32 %s115_s13, 4  ;;  %s38_s14 = int_to_ptr.vmem [resolvable:$true] %s37_s14 }
   0x9   :  { %56 = vpow2.f32 %v27_v2 }
   0xa   :  { %58 = vpow2.f32 %v29_v3 }
   0xf   :  { %v57_v4 = vpop.eup %56 }
  0x10   :  { %v59_v5 = vpop.eup %58  ;;  %31 = vst [vmem:[#allocation5] sm:$0xff] %v57_v4 }
  0x11   :  { %32 = vst [vmem:[#allocation5 + $0x8] sm:$0xff] %v59_v5 }
  0x12   :  { %45 = dma.vmem_to_hbm [thread:$0]  %s38_s14, 256, %s40_s0, [#allocation4], %s113_s11, %s113_s11, %s114_s12  }
  0x13   :  { %110 = dma.done.wait [#allocation4], 256  }
  0x14   :  { %111 = vsyncadd [#allocation4], 4294967040 }
  0x15   :  { %50 = vsyncpa [#allocation3], 1 }
  0x16   :  { %51 = vsyncpa [#allocation4], 1 }

</bundles_post_ra>
